<compile_context>
chip_gen: v7x
topology: tpu7x:2x2x1
jax: 0.10.0
libtpu: 0.0.40
codegen_flags: <defaults>
</compile_context>

<pallas_src>
import functools

import jax
import jax.numpy as jnp
import numpy as np
from jax import lax
from jax.experimental import pallas as pl
from jax.experimental.pallas import tpu as pltpu


def _round_up(v, m):
    return ((v + m - 1) // m) * m


def _question_layer_kernel(x_ref, wt_ref, b_ref, out_ref, *,
                           inv_temp, compute_dtype, approx_recip):
    # x: (QB, S, F) compute_dtype; wt: (F_in, F_out) compute_dtype (pre-transposed
    # and pre-cast in the wrapper); b: (1, F) f32; out: (QB, F) f32.
    qb, s, f = x_ref.shape

    # 1x1 Conv1d == linear projection. Merge (QB, S) into one MXU M dimension so
    # the systolic array sees QB*S rows instead of S per matmul.
    x2 = x_ref[...].reshape(qb * s, f)
    y = jnp.dot(x2, wt_ref[...], preferred_element_type=jnp.float32) + b_ref[...]
    y = y.reshape(qb, s, f)                                    # (QB, S, F) f32

    # One shared MXU operand for both sides of the attention matmul (exactly
    # symmetric attn; also the only cast of y).
    y_c = y.astype(compute_dtype)

    # attn = (y @ y^T) / sqrt(F): batched 'qsf,qtf->qst' feature contraction;
    # scale the small (S, S) f32 result, not the (S, F) operand.
    attn = lax.dot_general(y_c, y_c, (((2,), (2,)), ((0,), (0,))),
                           preferred_element_type=jnp.float32) * inv_temp

    # softmax(attn, dim=0): column softmax computed directly (reductions along
    # the per-question row axis), so no symmetry assumption is needed and the
    # following matmul keeps a native minor-dim MXU contraction. All elementwise
    # math stays f32 (v5e VPU/EUP have no bf16 path).
    m = jnp.max(attn, axis=1, keepdims=True)                   # (QB, 1, S)
    e = jnp.exp(attn - m)
    denom = jnp.sum(e, axis=1, keepdims=True)                  # (QB, 1, S)
    p = e * pl.reciprocal(denom, approx=approx_recip)          # columns sum to 1

    # out = softmax(attn, dim=0) @ y, batched over QB ('qsc,qcf->qsf').
    out = lax.dot_general(p.astype(compute_dtype), y_c,
                          (((2,), (1,)), ((0,), (0,))),
                          preferred_element_type=jnp.float32)  # (QB, S, F) f32

    # max_pool1d with kernel_size == S  ==  max over the sequence axis; dense
    # (QB, F) writeback (QB multiple of 8, F lane-aligned in the demo).
    out_ref[...] = jnp.max(out, axis=1)                        # (QB, F)

    # TODO(synk): for large S (> ~1K on v7x's 64 MiB VMEM, ~2K on v5e/v6e) the
    # (QB, S, S) attention tile should be flash-tiled (two-pass column softmax
    # over S-chunks) instead of materialized in VMEM.
    # TODO(synk): training-mode dropout on the query projection could be added
    # with pltpu.prng_random_bits; eval mode is the identity.
    # TODO(synk): if S / F become ragged in production, add an explicit
    # iota-based mask before the exp/sum rather than relying on Mosaic's
    # padded-tile handling.


def question_layer_forward(x, w, b, *, compute_dtype=jnp.bfloat16, qb=None):
    """x: (B, S, F) or (S, F) f32; w: (F, F) Conv1d-1x1 weight (out, in); b: (F,)."""
    x = jnp.asarray(x, jnp.float32)
    squeeze = x.ndim == 2
    if squeeze:
        x = x[None]
    B, S, F_ = x.shape

    # Question-block size per grid step: ~256 MXU rows (QB*S), QB a multiple of 8
    # for a sublane-dense output tile, and >= 2 grid steps kept when the batch
    # allows it so both v7x TensorCores get work.
    if qb is None:
        qb = _round_up(max(1, -(-256 // S)), 8)
        if 8 < B <= qb:
            qb = _round_up(-(-B // 2), 8)
        qb = max(1, min(qb, _round_up(B, 8)))
    B_pad = _round_up(B, qb)
    if B_pad != B:
        x = jnp.concatenate([x, jnp.zeros((B_pad - B, S, F_), x.dtype)], axis=0)

    inv_temp = float(1.0 / np.sqrt(F_))
    approx = compute_dtype != jnp.float32        # exact reciprocal in f32 mode

    # Cast the MXU operands once in the wrapper (halves HBM read traffic and the
    # resident weight); bias and all accumulation stay f32.
    x_in = x.astype(compute_dtype)
    wt = jnp.asarray(w, jnp.float32).T.astype(compute_dtype)   # (F_in, F_out)
    b2 = jnp.asarray(b, jnp.float32).reshape(1, F_)

    kernel = functools.partial(
        _question_layer_kernel,
        inv_temp=inv_temp, compute_dtype=compute_dtype, approx_recip=approx)

    # Rough per-step VMEM footprint; raise the scoped limit only when needed,
    # capped below v7x's 64 MiB physical VMEM.
    op_bytes = jnp.dtype(compute_dtype).itemsize
    est = (2 * qb * S * F_ * op_bytes            # double-buffered input block
           + 2 * F_ * F_ * op_bytes              # resident weight
           + 2 * qb * F_ * 4                     # double-buffered output block
           + qb * S * F_ * (2 * 4 + op_bytes)    # y f32, out f32, y compute-dtype
           + qb * S * S * (3 * 4 + op_bytes))    # attn / exp / p f32 + p cast
    vmem_limit = None
    if est > (32 << 20):
        vmem_limit = int(min(_round_up(est + (est >> 2), 1 << 20), 60 << 20))

    out = pl.pallas_call(
        kernel,
        out_shape=jax.ShapeDtypeStruct((B_pad, F_), jnp.float32),
        grid_spec=pltpu.PrefetchScalarGridSpec(
            num_scalar_prefetch=0,
            grid=(B_pad // qb,),
            in_specs=[
                # QB questions per grid step; kernel sees (QB, S, F)
                pl.BlockSpec((qb, S, F_), lambda bi: (bi, 0, 0)),
                # weight / bias stay resident across the whole grid
                pl.BlockSpec((F_, F_), lambda bi: (0, 0)),
                pl.BlockSpec((1, F_), lambda bi: (0, 0)),
            ],
            out_specs=pl.BlockSpec((qb, F_), lambda bi: (bi, 0)),
        ),
        compiler_params=pltpu.CompilerParams(
            dimension_semantics=("parallel",),
            vmem_limit_bytes=vmem_limit),
    )(x_in, wt, b2)

    out = out[:B]                                # drop batch padding
    return out[0] if squeeze else out


def reference_forward(x, w, b):
    """Pure-JAX reference mirroring the PyTorch forward (eval mode). x: (B, S, F)."""
    F_ = x.shape[-1]
    y = jnp.einsum('bsf,gf->bsg', x, w) + b[None, None, :]
    attn = jnp.einsum('bsf,btf->bst', y, y) / np.sqrt(F_)
    p = jax.nn.softmax(attn, axis=1)             # torch Softmax(dim=0) of the (S,S) matrix
    out = jnp.einsum('bst,btf->bsf', p, y)
    return jnp.max(out, axis=1)                  # max-pool over the sequence


if __name__ == "__main__":
    # Batch of questions, lane-dense feature width. qb auto-selects 8 -> grid=(2,).
    B, S, F = 16, 16, 128
    key = jax.random.PRNGKey(0)
    kx, kw, kb = jax.random.split(key, 3)

    x = jax.random.normal(kx, (B, S, F), dtype=jnp.float32)
    # Conv1d(F, F, kernel_size=1) weight is (F, F, 1); kernel dim squeezed.
    w = jax.random.normal(kw, (F, F), dtype=jnp.float32) * (1.0 / np.sqrt(F))
    b = jax.random.normal(kb, (F,), dtype=jnp.float32) * 0.1

    ref = reference_forward(x, w, b)

    # Exact-math path (f32 matmuls, exact reciprocal): tight check of semantics.
    out_f32 = jax.block_until_ready(
        question_layer_forward(x, w, b, compute_dtype=jnp.float32))
    np.testing.assert_allclose(np.asarray(out_f32), np.asarray(ref),
                               rtol=1e-4, atol=1e-4)

    # Fast path (bf16 MXU operands, f32 accumulation + f32 softmax, approx recip).
    out_bf16 = jax.block_until_ready(question_layer_forward(x, w, b))
    np.testing.assert_allclose(np.asarray(out_bf16), np.asarray(ref),
                               rtol=8e-2, atol=8e-2)

    # Smaller, non-lane-aligned shape (single question, F = 32) still lowers
    # correctly via full-array blocks + batch padding to the question block.
    S2, F2 = 8, 32
    k2x, k2w, k2b = jax.random.split(jax.random.PRNGKey(1), 3)
    x2 = jax.random.normal(k2x, (S2, F2), dtype=jnp.float32)
    w2 = jax.random.normal(k2w, (F2, F2), dtype=jnp.float32) * (1.0 / np.sqrt(F2))
    b2 = jax.random.normal(k2b, (F2,), dtype=jnp.float32) * 0.1
    out2 = jax.block_until_ready(
        question_layer_forward(x2, w2, b2, compute_dtype=jnp.float32))
    ref2 = reference_forward(x2[None], w2, b2)[0]
    np.testing.assert_allclose(np.asarray(out2), np.asarray(ref2),
                               rtol=1e-4, atol=1e-4)

    print("KERNEL_OK")
</pallas_src>

<mosaic_0001>
module attributes {stable_mosaic.version = 11 : i64} {
  func.func @_question_layer_kernel(%arg0: i32, %arg1: memref<8x16x128xf32, #tpu.memory_space<vmem>>, %arg2: memref<128x128xf32, #tpu.memory_space<vmem>>, %arg3: memref<1x128xf32, #tpu.memory_space<vmem>>, %arg4: memref<8x128xf32, #tpu.memory_space<vmem>>) attributes {dimension_semantics = [#tpu.dimension_semantics<parallel>], iteration_bounds = array<i64: 2>, scalar_prefetch = 0 : i64, scratch_operands = 0 : i64, tpu.core_type = #tpu.core_type<tc>, window_params = [{transform_indices = @transform_0, window_bounds = array<i64: 8, 16, 128>}, {pipeline_mode = #tpu.pipeline_mode<synchronous>, transform_indices = @transform_1, window_bounds = array<i64: 128, 128>}, {pipeline_mode = #tpu.pipeline_mode<synchronous>, transform_indices = @transform_2, window_bounds = array<i64: 1, 128>}, {transform_indices = @transform_3, window_bounds = array<i64: 8, 128>}]} {
    %c0 = arith.constant 0 : index
    %c0_0 = arith.constant 0 : index
    %c0_1 = arith.constant 0 : index
    %0 = vector.load %arg1[%c0, %c0_0, %c0_1] : memref<8x16x128xf32, #tpu.memory_space<vmem>>, vector<8x16x128xf32>
    %1 = vector.shape_cast %0 : vector<8x16x128xf32> to vector<128x128xf32>
    %c0_2 = arith.constant 0 : index
    %c0_3 = arith.constant 0 : index
    %2 = vector.load %arg2[%c0_2, %c0_3] : memref<128x128xf32, #tpu.memory_space<vmem>>, vector<128x128xf32>
    %cst = arith.constant dense<0.000000e+00> : vector<128x128xf32>
    %3 = tpu.matmul %1, %2, %cst {dimension_numbers = #tpu.dot_dimension_numbers<[1], [0], [0], [1], [0, 0, 1, 1], [], []>} : vector<128x128xf32>, vector<128x128xf32>, vector<128x128xf32> -> vector<128x128xf32>
    %c0_4 = arith.constant 0 : index
    %c0_5 = arith.constant 0 : index
    %4 = vector.load %arg3[%c0_4, %c0_5] : memref<1x128xf32, #tpu.memory_space<vmem>>, vector<1x128xf32>
    %5 = vector.broadcast %4 : vector<1x128xf32> to vector<128x128xf32>
    %6 = arith.addf %3, %5 : vector<128x128xf32>
    %7 = vector.shape_cast %6 : vector<128x128xf32> to vector<8x16x128xf32>
    %cst_6 = arith.constant dense<0.000000e+00> : vector<8x16x16xf32>
    %8 = tpu.matmul %7, %7, %cst_6 {dimension_numbers = #tpu.dot_dimension_numbers<[2], [2], [1], [1], [0, 0, 0, 1, 1, 1], [0], [0]>} : vector<8x16x128xf32>, vector<8x16x128xf32>, vector<8x16x16xf32> -> vector<8x16x16xf32>
    %cst_7 = arith.constant 0.0883883461 : f32
    %9 = vector.broadcast %cst_7 : f32 to vector<8x16x16xf32>
    %10 = arith.mulf %8, %9 : vector<8x16x16xf32>
    %cst_8 = arith.constant dense<0xFF800000> : vector<8x16xf32>
    %11 = vector.multi_reduction <maximumf>, %10, %cst_8 [1] : vector<8x16x16xf32> to vector<8x16xf32>
    %12 = vector.shape_cast %11 : vector<8x16xf32> to vector<8x1x16xf32>
    %13 = vector.broadcast %12 : vector<8x1x16xf32> to vector<8x16x16xf32>
    %14 = arith.subf %10, %13 : vector<8x16x16xf32>
    %15 = math.exp %14 : vector<8x16x16xf32>
    %cst_9 = arith.constant dense<0.000000e+00> : vector<8x16xf32>
    %16 = vector.multi_reduction <add>, %15, %cst_9 [1] : vector<8x16x16xf32> to vector<8x16xf32>
    %17 = vector.shape_cast %16 : vector<8x16xf32> to vector<8x1x16xf32>
    %18 = tpu.reciprocal %17 : vector<8x1x16xf32> -> vector<8x1x16xf32>
    %19 = vector.broadcast %18 : vector<8x1x16xf32> to vector<8x16x16xf32>
    %20 = arith.mulf %15, %19 : vector<8x16x16xf32>
    %cst_10 = arith.constant dense<0.000000e+00> : vector<8x16x128xf32>
    %21 = tpu.matmul %20, %7, %cst_10 {dimension_numbers = #tpu.dot_dimension_numbers<[2], [1], [1], [2], [0, 0, 0, 1, 1, 2], [0], [0]>} : vector<8x16x16xf32>, vector<8x16x128xf32>, vector<8x16x128xf32> -> vector<8x16x128xf32>
    %cst_11 = arith.constant dense<0xFF800000> : vector<8x128xf32>
    %22 = vector.multi_reduction <maximumf>, %21, %cst_11 [1] : vector<8x16x128xf32> to vector<8x128xf32>
    %c0_12 = arith.constant 0 : index
    %c0_13 = arith.constant 0 : index
    %23 = vector.load %arg4[%c0_12, %c0_13] : memref<8x128xf32, #tpu.memory_space<vmem>>, vector<8x128xf32>
    tpu.vector_store %arg4[%c0_12, %c0_13], %22 {strides = array<i32>} : memref<8x128xf32, #tpu.memory_space<vmem>>, vector<8x128xf32>,
    return
  }
  func.func @transform_0(%arg0: i32) -> (i32, i32, i32) {
    %c0_i32 = arith.constant 0 : i32
    %c0_i32_0 = arith.constant 0 : i32
    %c0_i32_1 = arith.constant 0 : i32
    return %arg0, %c0_i32, %c0_i32_0 : i32, i32, i32
  }
  func.func @transform_1(%arg0: i32) -> (i32, i32) {
    %c0_i32 = arith.constant 0 : i32
    %c0_i32_0 = arith.constant 0 : i32
    %c0_i32_1 = arith.constant 0 : i32
    return %c0_i32, %c0_i32_0 : i32, i32
  }
  func.func @transform_2(%arg0: i32) -> (i32, i32) {
    %c0_i32 = arith.constant 0 : i32
    %c0_i32_0 = arith.constant 0 : i32
    %c0_i32_1 = arith.constant 0 : i32
    return %c0_i32, %c0_i32_0 : i32, i32
  }
  func.func @transform_3(%arg0: i32) -> (i32, i32) {
    %c0_i32 = arith.constant 0 : i32
    %c0_i32_0 = arith.constant 0 : i32
    return %arg0, %c0_i32 : i32, i32
  }
}

</mosaic_0001>

<bundles_post_ra>
// kernel: tpu_custom_call.1
= control target key start
LH: loop header
LB: loop body
LE: loop exit
PB: predicated region body
PF: predicated region fallthrough
CT: control target
= control target key end

     0   :  { %8 = vsyncpa [#allocation3], 0  ;;  %s3107_s0 = inlined_call_operand.hbm [shape: f32[16,16,128], index: 0, kind: input, shape index: {}]   ;;  %s3108_s1 = inlined_call_operand.hbm [shape: f32[128,128], index: 1, kind: input, shape index: {}]   ;;  %s3109_s2 = inlined_call_operand.vmem [shape: f32[1,128], index: 2, kind: input, shape index: {}]   ;;  %s3110_s3 = inlined_call_operand.hbm [shape: f32[16,128], index: 3, kind: output, shape index: {}]  }
   0x1   :  { %10 = vsyncpa [#allocation3 + $0x1], 0 }
   0x2   :  { %11 = vsyncpa [#allocation6], 0 }
   0x3   :  { %12 = vsyncpa [#allocation4], 0 }
   0x4   :  { %14 = vsyncpa [#allocation4 + $0x1], 0  ;;  %s2702_s12 = smov 0   ;;  %s2704_s13 = smov 0  }
   0x5   :  { %s2706_s14 = smov 0   ;;  %s2708_s15 = smov 0  }
   0x6 LB: > { %s2723_s16 = sadd.s32 4294967295, %s2675_s15   ;;  %s2045_s17 = sadd.s32 4294967294, %s2675_s15   ;;  %s2675_s15 = sphi %s2708_s15, %s3130_s15   ;;  %s2671_s14 = sphi %s2706_s14, %s3129_s14   ;;  %s2667_s13 = sphi %s2704_s13, %s3128_s13   ;;  %s2663_s12 = sphi %s2702_s12, %s3127_s12  }
   0x7   : > { %p40_p0 = scmp.ne.s32.totalorder %s2667_s13, %s2663_s12  ;;  %p3111_p1 = scmp.eq.s32.totalorder %s2723_s16, 0 }
   0x8   : > { %p112_p3 = scmp.eq.s32.totalorder %s2045_s17, 1  ;;  %p2046_p5 = scmp.ge.s32.totalorder %s2675_s15, 1 }
   0x9   : > { %p2732_p4 = por %p3111_p1, %p40_p0  ;;  %p119_p7 = scmp.lt.s32.totalorder %s2675_s15, 3 }
   0xa   : > { %p2737_p6 = por %p112_p3, %p40_p0  ;;  %s2677_s21 = smov [#allocation5]  }
   0xb   : > { %s3114_s18 = scalar_select %p2732_p4, 1, 0 }
   0xc   : > { %s3115_s19 = scalar_select %p2737_p6, 1, 0 }
   0xd   : > { %p2742_p8 = pnand %p2046_p5, %p119_p7  ;;  %s131_s22 = sshll.u32 %s2677_s21, 4  ;;  %s2746_s22 = int_to_ptr.vmem [resolvable:$true] %s131_s22 }
   0xe   : > { %s2758_s24 = sadd.s32 1, %s2675_s15   ;;  %s27_s25 = sadd.s32 1, %s2671_s14 }
   0xf   : > { %s3116_s20 = scalar_select %p2742_p8, 1, 0 }
  0x10   : > { %p2448_p9 = pneg %p2742_p8  ;;  %s24_s26 = ssub.s32 %s2675_s15, %s2758_s24 }
  0x11   : > { %s2547_s29 = scalar_lea.hbm %s3108_s1, 2048 }
  0x12   : > { %p2753_p11 = pnand %p2448_p9, %p3111_p1  ;;  %p2548_p12 = scmp.ne.s32.totalorder %s3108_s1, %s2547_s29 }
  0x13   : > { %p2554_p5 = scmp.lt.u32.totalorder %s2547_s29, %s3108_s1 }
  0x14   : > { %p2549_p13 = pneg %p2753_p11 }
  0x16   : > { %p2550_p0 = pnand %p2549_p13, %p2548_p12 }
  0x18   : > { %p2551_p3 = pneg %p2550_p0 }
  0x1a   : > { %p2556_p7 = pnand %p2554_p5, %p2551_p3 }
  0x1c   : > { %2559 = shalt.err (!%p2556_p7)
}
  0x1d   : > { %s2560_s7 = scalar_lea.vmem %s2746_s22, 2048  ;;  %p2568_p2 = scmp.lt.s32.totalorder %s2746_s22, %s2746_s22 }
  0x1e   : > { %p2561_p9 = scmp.ne.s32.totalorder %s2746_s22, %s2560_s7  ;;  %p2569_p6 = scmp.lt.s32.totalorder %s2560_s7, %s2560_s7 }
  0x20   : > { %p2563_p10 = pnand %p2561_p9, %p2549_p13  ;;  %p2570_p4 = por %p2569_p6, %p2568_p2 }
  0x22   : > { %p2564_p1 = pneg %p2563_p10 }
  0x24   : > { %p2571_p8 = pnand %p2570_p4, %p2564_p1 }
  0x26   : > { %2574 = shalt.err (!%p2571_p8)
}
  0x27   : > { %s2678_s8 = smov 128   ;;  %s2679_s9 = smov 8  }
  0x28   : > { %2451 = dma.hbm_to_vmem [thread:$0]  (!%p2753_p11), %s3108_s1, 2048, %s2746_s22, [#allocation6], %s2678_s8, %s2678_s8, %s2679_s9  }
  0x29   : > { %p25_p1 = scmp.eq.s32.totalorder %s24_s26, 0  ;;  %p34_p2 = scmp.ne.s32.totalorder %s2671_s14, %s2667_s13 }
  0x2a   : > { %p35_p4 = scmp.eq.s32.totalorder %s2675_s15, 0  ;;  %p2461_p6 = scmp.lt.s32.totalorder %s2675_s15, 2 }
  0x2b   : > { %s2792_s17 = scalar_select %p25_p1, %s2671_s14, %s27_s25  }
  0x2c   : > { %p36_p8 = por %p35_p4, %p34_p2  ;;  %p3118_p10 = scmp.eq.s32.totalorder %s2723_s16, 1 }
  0x2d   : > { %s148_s23 = sand.u32 1, %s2671_s14   ;;  %s2079_s27 = sshll.u32 %s2675_s15, 11 }
  0x2e   : > { %p2796_p12 = por %p3118_p10, %p34_p2  ;;  %s2049_s28 = sshll.u32 %s148_s23, 7 }
  0x2f   : > { %s2805_s4 = scalar_lea.hbm %s3107_s0, %s2079_s27  ;;  %s152_s22 = scalar_lea.vmem [#allocation2], %s2049_s28 }
  0x30   : > { %s160_s25 = sshll.u32 %s152_s22, 4  ;;  %p2807_p11 = pnand %p2461_p6, %p36_p8  ;;  %s2811_s25 = int_to_ptr.vmem [resolvable:$true] %s160_s25 }
  0x31   : > { %s2813_s5 = scalar_lea.sflag [#allocation3], %s148_s23  ;;  %s2575_s6 = scalar_lea.hbm %s2805_s4, 2048 }
  0x32   : > { %p2576_p13 = scmp.ne.s32.totalorder %s2805_s4, %s2575_s6  ;;  %p2577_p0 = pneg %p2807_p11 }
  0x33   : > { %s2580_s11 = scalar_lea.hbm %s3107_s0, 4096  ;;  %p2581_p7 = scmp.lt.u32.totalorder %s2805_s4, %s3107_s0 }
  0x34   : > { %p2578_p3 = pnand %p2577_p0, %p2576_p13  ;;  %p2582_p9 = scmp.lt.u32.totalorder %s2580_s11, %s2575_s6 }
  0x35   : > { %p2584_p2 = scmp.lt.u32.totalorder %s2575_s6, %s2805_s4 }
  0x36   : > { %p2579_p5 = pneg %p2578_p3  ;;  %p2583_p1 = por %p2582_p9, %p2581_p7 }
  0x38   : > { %p2585_p4 = por %p2584_p2, %p2583_p1 }
  0x3a   : > { %p2586_p6 = pnand %p2585_p4, %p2579_p5 }
  0x3c   : > { %2589 = shalt.err (!%p2586_p6)
}
  0x3d   : > { %s2590_s23 = scalar_lea.vmem %s2811_s25, 2048  ;;  %s2680_s29 = smov [#allocation2]  }
  0x3e   : > { %p2591_p8 = scmp.ne.s32.totalorder %s2811_s25, %s2590_s23  ;;  %s2595_s30 = sshll.u32 %s2680_s29, 4  ;;  %s2596_s30 = int_to_ptr.vmem [resolvable:$false] %s2595_s30 }
  0x3f   : > { %s2597_s22 = scalar_lea.vmem %s2596_s30, 4096  ;;  %p2598_p3 = scmp.lt.s32.totalorder %s2811_s25, %s2596_s30 }
  0x40   : > { %p2593_p10 = pnand %p2591_p8, %p2577_p0  ;;  %p2599_p7 = scmp.lt.s32.totalorder %s2597_s22, %s2590_s23 }
  0x42   : > { %p2594_p13 = pneg %p2593_p10  ;;  %p2600_p9 = por %p2599_p7, %p2598_p3 }
  0x44   : > { %p2601_p1 = pnand %p2600_p9, %p2594_p13 }
  0x46   : > { %2604 = shalt.err (!%p2601_p1)
}
  0x47   : > { %2455 = dma.hbm_to_vmem [thread:$0]  (!%p2807_p11), %s2805_s4, 2048, %s2811_s25, %s2813_s5, %s2678_s8, %s2678_s8, %s2679_s9  }
  0x48   : > { %p3121_p0 = scmp.ne.s32.totalorder %s3116_s20, 0 }
  0x49   : > { %s2847_s6 = sand.u32 (!%p3121_p0), 1, %s2667_s13   ;;  %p3122_p5 = scmp.ne.s32.totalorder (!%p3121_p0), %s3114_s18, 0 }
  0x4a   : > { %172 = sbr.rel (%p3121_p0) target bundleno = 915 (0x393), region = 32  ;;  %s2054_s7 = sshll.u32 (!%p3121_p0), %s2847_s6, 7 }
  0x4b   : > { %s175_s10 = scalar_lea.sflag (!%p3121_p0), [#allocation3], %s2847_s6  ;;  %s2851_s11 = scalar_lea.vmem (!%p3121_p0), [#allocation2], %s2054_s7 }
  0x51   : > { %2650 = dma.done.wait (%p3122_p5), %s175_s10, 2048  }
  0x52   : > { %2652 = vsyncadd (%p3122_p5), %s175_s10, 4294965248  ;;  %p3123_p11 = scmp.eq.s32.totalorder %s2723_s16, 0 }
  0x54   : > { %2654 = dma.done.wait (%p3123_p11), [#allocation6], 2048   ;;  %p3124_p2 = pmov %p3123_p11 }
  0x55   : > { %v222_v0 = vld [vmem:[#allocation5] sm:$0xff]  ;;  %v223_v1 = vld [vmem:[#allocation5 + $0x8] sm:$0xff]  ;;  %v224_v2 = vld [vmem:[#allocation5 + $0x10] sm:$0xff]  ;;  %vm1006_vm0 = vcmask 130048   ;;  %vm1935_vm1 = vcmask 1041409   ;;  %vm1937_vm2 = vcmask 1042434  }
  0x56   : > { %2656 = vsyncadd (%p3124_p2), [#allocation6], 4294965248  ;;  %v2344_v3 = vpack.c.bf16 %v223_v1, %v222_v0  ;;  %v225_v4 = vld [vmem:[#allocation5 + $0x18] sm:$0xff]  ;;  %v226_v6 = vld [vmem:[#allocation5 + $0x20] sm:$0xff]  ;;  %vm1939_vm3 = vcmask 1043459   ;;  %vm1941_vm4 = vcmask 1044484  }
  0x57   : > { %v2348_v5 = vpack.c.bf16 %v225_v4, %v224_v2  ;;  %v227_v7 = vld [vmem:[#allocation5 + $0x28] sm:$0xff]  ;;  %v206_v9 = vld [vmem:[%s2851_s11] sm:$0xff]  ;;  %v228_v10 = vld [vmem:[#allocation5 + $0x30] sm:$0xff]  ;;  %vm1943_vm5 = vcmask 1045509   ;;  %s2056_s8 = sshll.u32 %s2847_s6, 3  ;;  %vm1945_vm6 = vcmask 1046534  }
  0x58   : > { %2345 = vmatprep.subr.bf16.mxu0 %v2344_v3  ;;  %v2352_v8 = vpack.c.bf16 %v227_v7, %v226_v6  ;;  %v229_v11 = vld [vmem:[#allocation5 + $0x38] sm:$0xff]  ;;  %2208 = vmatprep.mubr.f32.mxu0 %v206_v9  ;;  %v230_v13 = vld [vmem:[#allocation5 + $0x40] sm:$0xff]  ;;  %v231_v14 = vld [vmem:[#allocation5 + $0x48] sm:$0xff]  ;;  %s2075_s9 = sshll.u32 %s2723_s16, 7  ;;  %s204_s4 = scalar_lea.vmem [#allocation7], %s2056_s8  ;;  %vm1947_vm7 = vcmask 1047559  }
  0x59   : > { %2347 = vmatpush3.bf16.msra.mxu0 %v2344_v3  ;;  %v2356_v12 = vpack.c.bf16 %v229_v11, %v228_v10  ;;  %v2360_v15 = vpack.c.bf16 %v231_v14, %v230_v13  ;;  %v232_v16 = vld [vmem:[#allocation5 + $0x50] sm:$0xff]  ;;  %v233_v17 = vld [vmem:[#allocation5 + $0x58] sm:$0xff]  ;;  %v234_v19 = vld [vmem:[#allocation5 + $0x60] sm:$0xff]  ;;  %s1965_s25 = sshll.u32 %s204_s4, 4  ;;  %s3063_s27 = scalar_lea.hbm %s3110_s3, %s2075_s9  ;;  %s3065_s25 = int_to_ptr.vmem [resolvable:$true] %s1965_s25 }
  0x5a   : > { %2349 = vmatprep.subr.bf16.mxu0 %v2348_v5  ;;  %v2364_v18 = vpack.c.bf16 %v233_v17, %v232_v16  ;;  %v235_v20 = vld [vmem:[#allocation5 + $0x68] sm:$0xff]  ;;  %v236_v22 = vld [vmem:[#allocation5 + $0x70] sm:$0xff]  ;;  %v237_v23 = vld [vmem:[#allocation5 + $0x78] sm:$0xff]  ;;  %s1952_s28 = scalar_lea.sflag [#allocation4], %s2847_s6  ;;  %s2605_s16 = scalar_lea.vmem %s3065_s25, 128 }
  0x5b   : > { %v2368_v21 = vpack.c.bf16 %v235_v20, %v234_v19  ;;  %v2372_v24 = vpack.c.bf16 %v237_v23, %v236_v22  ;;  %v207_v25 = vld [vmem:[%s2851_s11 + $0x8] sm:$0xff]  ;;  %v208_v26 = vld [vmem:[%s2851_s11 + $0x10] sm:$0xff]  ;;  %v209_v27 = vld [vmem:[%s2851_s11 + $0x18] sm:$0xff]  ;;  %p2606_p4 = scmp.ne.s32.totalorder %s3065_s25, %s2605_s16  ;;  %s2681_s23 = smov [#allocation7]  }
  0x5c   : > { %v210_v28 = vld [vmem:[%s2851_s11 + $0x20] sm:$0xff]  ;;  %v211_v29 = vld [vmem:[%s2851_s11 + $0x28] sm:$0xff]  ;;  %v212_v30 = vld [vmem:[%s2851_s11 + $0x30] sm:$0xff]  ;;  %s2609_s29 = sshll.u32 %s2681_s23, 4  ;;  %s2610_s29 = int_to_ptr.vmem [resolvable:$false] %s2609_s29 }
  0x5d   : > { %2351 = vmatpush3.bf16.msra.mxu0 %v2348_v5  ;;  %v213_v31 = vld [vmem:[%s2851_s11 + $0x38] sm:$0xff]  ;;  %v214_v32 = vld [vmem:[%s2851_s11 + $0x40] sm:$0xff]  ;;  %v215_v33 = vld [vmem:[%s2851_s11 + $0x48] sm:$0xff]  ;;  %p2607_p6 = pnand %p2606_p4, %p2796_p12  ;;  %s2611_s30 = scalar_lea.vmem %s2610_s29, 256 }
  0x5e   : > { %2353 = vmatprep.subr.bf16.mxu0 %v2352_v8  ;;  %v216_v34 = vld [vmem:[%s2851_s11 + $0x50] sm:$0xff]  ;;  %v217_v35 = vld [vmem:[%s2851_s11 + $0x58] sm:$0xff]  ;;  %v218_v36 = vld [vmem:[%s2851_s11 + $0x60] sm:$0xff]  ;;  %p2612_p10 = scmp.lt.s32.totalorder %s3065_s25, %s2610_s29  ;;  %p2613_p13 = scmp.lt.s32.totalorder %s2611_s30, %s2605_s16 }
  0x5f   : > { %v219_v37 = vld [vmem:[%s2851_s11 + $0x68] sm:$0xff]  ;;  %v220_v38 = vld [vmem:[%s2851_s11 + $0x70] sm:$0xff]  ;;  %v221_v39 = vld [vmem:[%s2851_s11 + $0x78] sm:$0xff]  ;;  %p2608_p8 = pneg %p2607_p6 }
  0x60   : > { %v2057_v40 = vld [vmem:[%s3109_s2] ss:$0 sm:$0xff]  ;;  %p2614_p3 = por %p2613_p13, %p2612_p10 }
  0x61   : > { %2355 = vmatpush3.bf16.msra.mxu0 %v2352_v8 }
  0x62   : > { %2357 = vmatprep.subr.bf16.mxu0 %v2356_v12  ;;  %p2615_p7 = pnand %p2614_p3, %p2608_p8 }
  0x65   : > { %2359 = vmatpush3.bf16.msra.mxu0 %v2356_v12 }
  0x66   : > { %2361 = vmatprep.subr.bf16.mxu0 %v2360_v15 }
  0x69   : > { %2363 = vmatpush3.bf16.msra.mxu0 %v2360_v15 }
  0x6a   : > { %2365 = vmatprep.subr.bf16.mxu0 %v2364_v18 }
  0x6d   : > { %2367 = vmatpush3.bf16.msra.mxu0 %v2364_v18 }
  0x6e   : > { %2369 = vmatprep.subr.bf16.mxu0 %v2368_v21 }
  0x71   : > { %2371 = vmatpush3.bf16.msra.mxu0 %v2368_v21 }
  0x72   : > { %2373 = vmatprep.subr.bf16.mxu0 %v2372_v24 }
  0x75   : > { %2375 = vmatpush3.bf16.msra.mxu0 %v2372_v24 }
  0x78   : > { %2209 = vmatmul.mubr.f32.vlgmr.msra.gmra.mrb[0].mxu0 %v207_v25 }
  0x79   : > { %2211 = vmatprep.mubr.f32.mxu0 %v208_v26 }
  0x7c   : > { %2212 = vmatmul.mubr.f32.gmra.mrb[2].mxu0 %v209_v27 }
  0x7d   : > { %2214 = vmatprep.mubr.f32.mxu0 %v210_v28 }
  0x80   : > { %2215 = vmatmul.mubr.f32.gmra.mrb[4].mxu0 %v211_v29 }
  0x81   : > { %2217 = vmatprep.mubr.f32.mxu0 %v212_v30 }
  0x84   : > { %2218 = vmatmul.mubr.f32.gmra.mrb[6].mxu0 %v213_v31 }
  0x85   : > { %2220 = vmatprep.mubr.f32.mxu0 %v214_v32 }
  0x88   : > { %2221 = vmatmul.mubr.f32.gmra.mrb[8].mxu0 %v215_v33 }
  0x89   : > { %2223 = vmatprep.mubr.f32.mxu0 %v216_v34 }
  0x8c   : > { %2224 = vmatmul.mubr.f32.gmra.mrb[10].mxu0 %v217_v35 }
  0x8d   : > { %2226 = vmatprep.mubr.f32.mxu0 %v218_v36 }
  0x90   : > { %2227 = vmatmul.mubr.f32.gmra.mrb[12].mxu0 %v219_v37 }
  0x91   : > { %2229 = vmatprep.mubr.f32.mxu0 %v220_v38 }
  0x94   : > { %2230 = vmatmul.mubr.f32.gmra.mrb[14].mxu0 %v221_v39 }
 0x14b   : > { %v2210_v41 = vpop.f32.mrb[0].mxu0 }
 0x14c   : > { %v317_v42 = vadd.f32 %v2210_v41, %v2057_v40  ;;  %v311_v43 = vpop.f32.mrb[1].mxu0 }
 0x14d   : > { %v312_v44 = vadd.f32 %v2057_v40, %v311_v43 }
 0x14f   : > { %v2880_v45 = vpack.c.bf16 %v317_v42, %v312_v44  ;;  %v2213_v46 = vpop.f32.mrb[2].mxu0  ;;  %2236 = vmatprep.mubr.f32.mxu1 %v312_v44 }
 0x150   : > { %v327_v47 = vadd.f32 %v2213_v46, %v2057_v40  ;;  %v321_v48 = vpop.f32.mrb[3].mxu0 }
 0x151   : > { %v322_v49 = vadd.f32 %v2057_v40, %v321_v48  ;;  %2377 = vmatprep.subr.bf16.mxu1 %v2880_v45 }
 0x152   : > { %2379 = vmatpush3.bf16.xpose.msra.mxu1 %v2880_v45 }
 0x153   : > { %v2884_v50 = vpack.c.bf16 %v327_v47, %v322_v49  ;;  %v2216_v51 = vpop.f32.mrb[4].mxu0 }
 0x154   : > { %v337_v52 = vadd.f32 %v2216_v51, %v2057_v40  ;;  %v331_v53 = vpop.f32.mrb[5].mxu0 }
 0x155   : > { %v332_v54 = vadd.f32 %v2057_v40, %v331_v53  ;;  %2381 = vmatprep.subr.bf16.mxu1 %v2884_v50 }
 0x157   : > { %v2384_v55 = vpack.c.bf16 %v337_v52, %v332_v54  ;;  %v2219_v56 = vpop.f32.mrb[6].mxu0 }
 0x158   : > { %v347_v57 = vadd.f32 %v2219_v56, %v2057_v40  ;;  %v341_v58 = vpop.f32.mrb[7].mxu0 }
 0x159   : > { %v342_v59 = vadd.f32 %v2057_v40, %v341_v58  ;;  %2237 = vmatmul.mubr.f32.vlgmr.msra.gmra.mrb[0].mxu1 %v317_v42 }
 0x15a   : > { %2383 = vmatpush3.bf16.xpose.msra.mxu1 %v2884_v50  ;;  %2243 = vmatprep.mubr.f32.mxu1 %v322_v49 }
 0x15b   : > { %v2888_v60 = vpack.c.bf16 %v347_v57, %v342_v59  ;;  %v2222_v61 = vpop.f32.mrb[8].mxu0  ;;  %2385 = vmatprep.subr.bf16.mxu1 %v2384_v55 }
 0x15c   : > { %v357_v62 = vadd.f32 %v2222_v61, %v2057_v40  ;;  %v351_v63 = vpop.f32.mrb[9].mxu0 }
 0x15d   : > { %v352_v0 = vadd.f32 %v2057_v40, %v351_v63 }
 0x15f   : > { %v2890_v1 = vpack.c.bf16 %v357_v62, %v352_v0  ;;  %v2225_v2 = vpop.f32.mrb[10].mxu0 }
 0x160   : > { %v367_v3 = vadd.f32 %v2225_v2, %v2057_v40  ;;  %v361_v4 = vpop.f32.mrb[11].mxu0 }
 0x161   : > { %v362_v5 = vadd.f32 %v2057_v40, %v361_v4  ;;  %2244 = vmatmul.mubr.f32.vlgmr.msra.gmra.mrb[2].mxu1 %v327_v47 }
 0x162   : > { %2387 = vmatpush3.bf16.xpose.msra.mxu1 %v2384_v55  ;;  %2250 = vmatprep.mubr.f32.mxu1 %v332_v54 }
 0x163   : > { %v2892_v6 = vpack.c.bf16 %v367_v3, %v362_v5  ;;  %v2228_v7 = vpop.f32.mrb[12].mxu0  ;;  %2389 = vmatprep.subr.bf16.mxu1 %v2888_v60 }
 0x164   : > { %v377_v8 = vadd.f32 %v2228_v7, %v2057_v40  ;;  %v371_v9 = vpop.f32.mrb[13].mxu0 }
 0x165   : > { %v372_v10 = vadd.f32 %v2057_v40, %v371_v9 }
 0x167   : > { %v2895_v11 = vpack.c.bf16 %v377_v8, %v372_v10  ;;  %v2231_v12 = vpop.f32.mrb[14].mxu0 }
 0x168   : > { %v387_v13 = vadd.f32 %v2231_v12, %v2057_v40  ;;  %v381_v14 = vpop.f32.mrb[15].mxu0 }
 0x169   : > { %v382_v15 = vadd.f32 %v2057_v40, %v381_v14  ;;  %2251 = vmatmul.mubr.f32.vlgmr.msra.gmra.mrb[4].mxu1 %v337_v52 }
 0x16a   : > { %2391 = vmatpush3.bf16.xpose.msra.mxu1 %v2888_v60  ;;  %2257 = vmatprep.mubr.f32.mxu1 %v342_v59 }
 0x16b   : > { %v2898_v16 = vpack.c.bf16 %v387_v13, %v382_v15  ;;  %2393 = vmatprep.subr.bf16.mxu1 %v2890_v1  ;;  %2285 = vmatprep.mubr.f32.mxu0 %v382_v15 }
 0x16d   : > { %2405 = vmatprep.subr.bf16.mxu0 %v2898_v16 }
 0x16e   : > { %2407 = vmatpush3.bf16.xpose.msra.mxu0 %v2898_v16 }
 0x16f   : > { %2417 = vmatprep.subr.bf16.mxu0 %v2384_v55 }
 0x171   : > { %2258 = vmatmul.mubr.f32.vlgmr.msra.gmra.mrb[6].mxu1 %v347_v57 }
 0x172   : > { %2395 = vmatpush3.bf16.xpose.msra.mxu1 %v2890_v1  ;;  %2264 = vmatprep.mubr.f32.mxu1 %v352_v0 }
 0x173   : > { %2397 = vmatprep.subr.bf16.mxu1 %v2892_v6 }
 0x175   : > { %2286 = vmatmul.mubr.f32.vlgmr.msra.gmra.mrb[16].mxu0 %v387_v13 }
 0x176   : > { %2419 = vmatpush3.bf16.msra.mxu0 %v2384_v55 }
 0x177   : > { %2425 = vmatprep.subr.bf16.mxu0 %v2890_v1 }
 0x179   : > { %2265 = vmatmul.mubr.f32.vlgmr.msra.gmra.mrb[8].mxu1 %v357_v62 }
 0x17a   : > { %2399 = vmatpush3.bf16.xpose.msra.mxu1 %v2892_v6  ;;  %2271 = vmatprep.mubr.f32.mxu1 %v362_v5 }
 0x17b   : > { %2401 = vmatprep.subr.bf16.mxu1 %v2895_v11 }
 0x181   : > { %2272 = vmatmul.mubr.f32.vlgmr.msra.gmra.mrb[10].mxu1 %v367_v3 }
 0x182   : > { %2403 = vmatpush3.bf16.xpose.msra.mxu1 %v2895_v11  ;;  %2278 = vmatprep.mubr.f32.mxu1 %v372_v10 }
 0x183   : > { %2409 = vmatprep.subr.bf16.mxu1 %v2880_v45 }
 0x189   : > { %2279 = vmatmul.mubr.f32.vlgmr.msra.gmra.mrb[12].mxu1 %v377_v8 }
 0x18a   : > { %2411 = vmatpush3.bf16.msra.mxu1 %v2880_v45 }
 0x18b   : > { %2413 = vmatprep.subr.bf16.mxu1 %v2884_v50 }
 0x22c   : > { %v2238_v17 = vpop.f32.mrb[0].mxu1 }
 0x22d   : > { %v991_v18 = vmul.f32 0.088388346, %v2238_v17  ;;  %v456_v19 = vpop.f32.mrb[1].mxu1 }
 0x22e   : > { %v990_v20 = vmul.f32 0.088388346, %v456_v19 }
 0x22f   : > { %v1008_v21 = vsel %vm1006_vm0, %v991_v18, -inf }
 0x230   : > { %v1007_v22 = vsel %vm1006_vm0, %v990_v20, -inf }
 0x231   : > { %v1009_v23 = vmax.f32 %v1007_v22, %v1008_v21 }
 0x233   : > { %v1010_v24 = vrot.slane %v1009_v23, 4 }
 0x234   : > { %v2245_v25 = vpop.f32.mrb[2].mxu1 }
 0x235   : > { %v1011_v26 = vmax.f32 %v1009_v23, %v1010_v24  ;;  %v993_v27 = vmul.f32 0.088388346, %v2245_v25  ;;  %v531_v28 = vpop.f32.mrb[3].mxu1 }
 0x236   : > { %v992_v29 = vmul.f32 0.088388346, %v531_v28 }
 0x237   : > { %v1012_v30 = vrot.slane %v1011_v26, 2  ;;  %v1017_v31 = vsel %vm1006_vm0, %v993_v27, -inf }
 0x238   : > { %v1016_v32 = vsel %vm1006_vm0, %v992_v29, -inf }
 0x239   : > { %v1013_v33 = vmax.f32 %v1011_v26, %v1012_v30  ;;  %v1018_v34 = vmax.f32 %v1016_v32, %v1017_v31 }
 0x23b   : > { %v1014_v35 = vrot.slane %v1013_v33, 1  ;;  %v1019_v36 = vrot.slane %v1018_v34, 4 }
 0x23c   : > { %v2252_v37 = vpop.f32.mrb[4].mxu1 }
 0x23d   : > { %v1015_v38 = vmax.f32 %v1013_v33, %v1014_v35  ;;  %v1020_v39 = vmax.f32 %v1018_v34, %v1019_v36  ;;  %v995_v40 = vmul.f32 0.088388346, %v2252_v37  ;;  %v606_v41 = vpop.f32.mrb[5].mxu1 }
 0x23e   : > { %v994_v42 = vmul.f32 0.088388346, %v606_v41 }
 0x23f   : > { %v1079_v43 = vsub.f32 %v990_v20, %v1015_v38  ;;  %v1080_v44 = vsub.f32 %v991_v18, %v1015_v38  ;;  %v1021_v45 = vrot.slane %v1020_v39, 2  ;;  %v1026_v46 = vsel %vm1006_vm0, %v995_v40, -inf }
 0x240   : > { %v1025_v47 = vsel %vm1006_vm0, %v994_v42, -inf }
 0x241   : > { %v1095_v48 = vmul.f32 1.442695, %v1079_v43  ;;  %v1097_v49 = vmul.f32 1.442695, %v1080_v44  ;;  %v1022_v51 = vmax.f32 %v1020_v39, %v1021_v45  ;;  %v1027_v52 = vmax.f32 %v1025_v47, %v1026_v46 }
 0x243   : > { %2499 = vpow2.f32 %v1095_v48  ;;  %v1023_v53 = vrot.slane %v1022_v51, 1  ;;  %v1028_v54 = vrot.slane %v1027_v52, 4 }
 0x244   : > { %2501 = vpow2.f32 %v1097_v49  ;;  %v2259_v55 = vpop.f32.mrb[6].mxu1 }
 0x245   : > { %v1024_v56 = vmax.f32 %v1022_v51, %v1023_v53  ;;  %v1029_v57 = vmax.f32 %v1027_v52, %v1028_v54  ;;  %v2918_v58 = vmul.f32 0.088388346, %v2259_v55  ;;  %v681_v59 = vpop.f32.mrb[7].mxu1 }
 0x246   : > { %v2920_v61 = vmul.f32 0.088388346, %v681_v59 }
 0x247   : > { %v1081_v62 = vsub.f32 %v992_v29, %v1024_v56  ;;  %v1082_v63 = vsub.f32 %v993_v27, %v1024_v56  ;;  %v1030_v0 = vrot.slane %v1029_v57, 2  ;;  %v1035_v2 = vsel %vm1006_vm0, %v2918_v58, -inf }
 0x248   : > { %v1034_v3 = vsel %vm1006_vm0, %v2920_v61, -inf  ;;  %v2287_v4 = vpop.f32.mrb[16].mxu0 }
 0x249   : > { %v1099_v5 = vmul.f32 1.442695, %v1081_v62  ;;  %v1101_v7 = vmul.f32 1.442695, %v1082_v63  ;;  %v1031_v8 = vmax.f32 %v1029_v57, %v1030_v0  ;;  %v1036_v9 = vmax.f32 %v1034_v3, %v1035_v2  ;;  %v981_v10 = vpop.f32.mrb[17].mxu0 }
 0x24a   : > { %v2926_v12 = vmul.f32 0.088388346, %v2287_v4  ;;  %v2928_v13 = vmul.f32 0.088388346, %v981_v10 }
 0x24b   : > { %2503 = vpow2.f32 %v1099_v5  ;;  %v1032_v14 = vrot.slane %v1031_v8, 1  ;;  %v1037_v15 = vrot.slane %v1036_v9, 4 }
 0x24c   : > { %2505 = vpow2.f32 %v1101_v7  ;;  %v1071_v17 = vsel %vm1006_vm0, %v2926_v12, -inf  ;;  %v1070_v18 = vsel %vm1006_vm0, %v2928_v13, -inf  ;;  %v2266_v19 = vpop.f32.mrb[8].mxu1 }
 0x24d   : > { %v2934_v20 = vpop.eup %2499  ;;  %v1033_v21 = vmax.f32 %v1031_v8, %v1032_v14  ;;  %v1038_v22 = vmax.f32 %v1036_v9, %v1037_v15  ;;  %v1072_v23 = vmax.f32 %v1070_v18, %v1071_v17  ;;  %v2936_v24 = vmul.f32 0.088388346, %v2266_v19  ;;  %v756_v25 = vpop.f32.mrb[9].mxu1 }
 0x24e   : > { %v2938_v26 = vpop.eup %2501  ;;  %v1127_v27 = vsel %vm1006_vm0, %v2934_v20, 0.0  ;;  %v2942_v28 = vmul.f32 0.088388346, %v756_v25 }
 0x24f   : > { %v1128_v29 = vsel %vm1006_vm0, %v2938_v26, 0.0  ;;  %v1083_v30 = vsub.f32 %v994_v42, %v1033_v21  ;;  %v1084_v31 = vsub.f32 %v995_v40, %v1033_v21  ;;  %v1039_v32 = vrot.slane %v1038_v22, 2 }
 0x250   : > { %v1129_v33 = vadd.f32 %v1128_v29, %v1127_v27  ;;  %v1073_v34 = vrot.slane %v1072_v23, 4  ;;  %v1044_v35 = vsel %vm1006_vm0, %v2936_v24, -inf  ;;  %v1043_v36 = vsel %vm1006_vm0, %v2942_v28, -inf }
 0x251   : > { %v1103_v37 = vmul.f32 1.442695, %v1083_v30  ;;  %v1105_v38 = vmul.f32 1.442695, %v1084_v31  ;;  %v1040_v39 = vmax.f32 %v1038_v22, %v1039_v32  ;;  %v1045_v41 = vmax.f32 %v1043_v36, %v1044_v35 }
 0x252   : > { %v1130_v43 = vrot.slane %v1129_v33, 4  ;;  %v1074_v44 = vmax.f32 %v1072_v23, %v1073_v34 }
 0x253   : > { %2507 = vpow2.f32 %v1103_v37  ;;  %v1041_v45 = vrot.slane %v1040_v39, 1  ;;  %v1046_v46 = vrot.slane %v1045_v41, 4 }
 0x254   : > { %v1131_v42 = vadd.f32 %v1130_v43, %v1129_v33  ;;  %2509 = vpow2.f32 %v1105_v38  ;;  %v1075_v40 = vrot.slane %v1074_v44, 2  ;;  %v2273_v47 = vpop.f32.mrb[10].mxu1 }
 0x255   : > { %v2950_v48 = vpop.eup %2503  ;;  %v1042_v49 = vmax.f32 %v1040_v39, %v1041_v45  ;;  %v1047_v51 = vmax.f32 %v1045_v41, %v1046_v46  ;;  %v2952_v52 = vmul.f32 0.088388346, %v2273_v47  ;;  %v831_v53 = vpop.f32.mrb[11].mxu1 }
 0x256   : > { %v2954_v54 = vpop.eup %2505  ;;  %v1132_v55 = vrot.slane %v1131_v42, 2  ;;  %v1136_v56 = vsel %vm1006_vm0, %v2950_v48, 0.0  ;;  %v1076_v57 = vmax.f32 %v1074_v44, %v1075_v40  ;;  %v2958_v59 = vmul.f32 0.088388346, %v831_v53 }
 0x257   : > { %v1137_v62 = vsel %vm1006_vm0, %v2954_v54, 0.0  ;;  %v1085_v63 = vsub.f32 %v2920_v61, %v1042_v49  ;;  %v1086_v0 = vsub.f32 %v2918_v58, %v1042_v49  ;;  %v1048_v2 = vrot.slane %v1047_v51, 2 }
 0x258   : > { %v1133_v3 = vadd.f32 %v1132_v55, %v1131_v42  ;;  %v1138_v4 = vadd.f32 %v1137_v62, %v1136_v56  ;;  %v1077_v5 = vrot.slane %v1076_v57, 1  ;;  %v1053_v7 = vsel %vm1006_vm0, %v2952_v52, -inf }
 0x259   : > { %v1107_v8 = vmul.f32 1.442695, %v1085_v63  ;;  %v1109_v9 = vmul.f32 1.442695, %v1086_v0  ;;  %v1049_v10 = vmax.f32 %v1047_v51, %v1048_v2  ;;  %v1052_v14 = vsel %vm1006_vm0, %v2958_v59, -inf }
 0x25a   : > { %v1139_v15 = vrot.slane %v1138_v4, 4  ;;  %v1078_v17 = vmax.f32 %v1076_v57, %v1077_v5  ;;  %v1054_v18 = vmax.f32 %v1052_v14, %v1053_v7  ;;  %v1134_v19 = vrot.slane %v1133_v3, 1 }
 0x25b   : > { %2511 = vpow2.f32 %v1107_v8  ;;  %v1050_v61 = vrot.slane %v1049_v10, 1 }
 0x25c   : > { %v1140_v58 = vadd.f32 %v1139_v15, %v1138_v4  ;;  %2513 = vpow2.f32 %v1109_v9  ;;  %v1093_v21 = vsub.f32 %v2928_v13, %v1078_v17  ;;  %v1094_v22 = vsub.f32 %v2926_v12, %v1078_v17  ;;  %v2280_v23 = vpop.f32.mrb[12].mxu1 }
 0x25d   : > { %v2970_v25 = vpop.eup %2507  ;;  %v1051_v27 = vmax.f32 %v1049_v10, %v1050_v61  ;;  %v1055_v29 = vrot.slane %v1054_v18, 4  ;;  %v2972_v30 = vmul.f32 0.088388346, %v2280_v23  ;;  %v906_v31 = vpop.f32.mrb[13].mxu1  ;;  %v1135_v32 = vadd.f32 %v1134_v19, %v1133_v3 }
 0x25e   : > { %v2974_v33 = vpop.eup %2509  ;;  %v1141_v34 = vrot.slane %v1140_v58, 2  ;;  %v1145_v35 = vsel %vm1006_vm0, %v2970_v25, 0.0  ;;  %v1123_v36 = vmul.f32 1.442695, %v1093_v21  ;;  %v1125_v37 = vmul.f32 1.442695, %v1094_v22 }
 0x25f   : > { %v1146_v12 = vsel %vm1006_vm0, %v2974_v33, 0.0  ;;  %v1087_v13 = vsub.f32 %v2942_v28, %v1051_v27  ;;  %v1088_v38 = vsub.f32 %v2936_v24, %v1051_v27  ;;  %v1056_v39 = vmax.f32 %v1054_v18, %v1055_v29 }
 0x260   : > { %v1142_v41 = vadd.f32 %v1141_v34, %v1140_v58  ;;  %v1147_v43 = vadd.f32 %v1146_v12, %v1145_v35  ;;  %2515 = vpow2.f32 %v1123_v36  ;;  %v1062_v44 = vsel %vm1006_vm0, %v2972_v30, -inf }
 0x261   : > { %2517 = vpow2.f32 %v1125_v37  ;;  %v1111_v45 = vmul.f32 1.442695, %v1087_v13  ;;  %v1113_v46 = vmul.f32 1.442695, %v1088_v38  ;;  %v1057_v42 = vrot.slane %v1056_v39, 2 }
 0x262   : > { %v1148_v40 = vrot.slane %v1147_v43, 4  ;;  %v2984_v47 = vmul.f32 0.088388346, %v906_v31  ;;  %2519 = vrcp.f32 %v1135_v32  ;;  %v1143_v49 = vrot.slane %v1142_v41, 1 }
 0x263   : > { %2521 = vpow2.f32 %v1111_v45  ;;  %v1058_v28 = vmax.f32 %v1056_v39, %v1057_v42 }
 0x264   : > { %v1149_v51 = vadd.f32 %v1148_v40, %v1147_v43  ;;  %2523 = vpow2.f32 %v1113_v46  ;;  %v1061_v24 = vsel %vm1006_vm0, %v2984_v47, -inf  ;;  %v1144_v53 = vadd.f32 %v1143_v49, %v1142_v41 }
 0x265   : > { %v2988_v55 = vpop.eup %2511  ;;  %v1059_v56 = vrot.slane %v1058_v28, 1  ;;  %v1063_v57 = vmax.f32 %v1061_v24, %v1062_v44 }
 0x266   : > { %v2990_v62 = vpop.eup %2513  ;;  %v1150_v63 = vrot.slane %v1149_v51, 2  ;;  %v1154_v0 = vsel %vm1006_vm0, %v2988_v55, 0.0  ;;  %2525 = vrcp.f32 %v1144_v53 }
 0x267   : > { %v1155_v2 = vsel %vm1006_vm0, %v2990_v62, 0.0  ;;  %v1060_v3 = vmax.f32 %v1058_v28, %v1059_v56  ;;  %v1064_v4 = vrot.slane %v1063_v57, 4 }
 0x268   : > { %v1151_v5 = vadd.f32 %v1150_v63, %v1149_v51  ;;  %v1156_v7 = vadd.f32 %v1155_v2, %v1154_v0 }
 0x269   : > { %v1089_v8 = vsub.f32 %v2958_v59, %v1060_v3  ;;  %v1090_v9 = vsub.f32 %v2952_v52, %v1060_v3  ;;  %v1065_v10 = vmax.f32 %v1063_v57, %v1064_v4 }
 0x26a   : > { %v2998_v14 = vpop.eup %2515  ;;  %v1157_v15 = vrot.slane %v1156_v7, 4  ;;  %v1152_v17 = vrot.slane %v1151_v5, 1 }
 0x26b   : > { %v3000_v18 = vpop.eup %2517  ;;  %v1190_v19 = vsel %vm1006_vm0, %v2998_v14, 0.0  ;;  %v1115_v61 = vmul.f32 1.442695, %v1089_v8  ;;  %v1117_v58 = vmul.f32 1.442695, %v1090_v9  ;;  %v1066_v21 = vrot.slane %v1065_v10, 2 }
 0x26c   : > { %v2520_v22 = vpop.eup %2519  ;;  %v1158_v23 = vadd.f32 %v1157_v15, %v1156_v7  ;;  %v1191_v59 = vsel %vm1006_vm0, %v3000_v18, 0.0  ;;  %v1153_v27 = vadd.f32 %v1152_v17, %v1151_v5 }
 0x26d   : > { %v3006_v52 = vpop.eup %2521  ;;  %v1192_v29 = vadd.f32 %v1191_v59, %v1190_v19  ;;  %2527 = vpow2.f32 %v1115_v61  ;;  %v1067_v31 = vmax.f32 %v1065_v10, %v1066_v21  ;;  %v1207_v32 = vmul.f32 %v2520_v22, %v2934_v20 }
 0x26e   : > { %v3009_v34 = vpop.eup %2523  ;;  %v1159_v35 = vrot.slane %v1158_v23, 2  ;;  %v1163_v36 = vsel %vm1006_vm0, %v3006_v52, 0.0  ;;  %2529 = vpow2.f32 %v1117_v58  ;;  %v1208_v37 = vmul.f32 %v2520_v22, %v2938_v26 }
 0x26f   : > { %v1193_v12 = vrot.slane %v1192_v29, 4  ;;  %v1164_v13 = vsel %vm1006_vm0, %v3009_v34, 0.0  ;;  %v1068_v38 = vrot.slane %v1067_v31, 1  ;;  %2292 = vmatprep.mubr.msk.f32.mxu1 %vm1006_vm0, %v1207_v32  ;;  %2531 = vrcp.f32 %v1153_v27 }
 0x270   : > { %v2526_v39 = vpop.eup %2525  ;;  %v1160_v41 = vadd.f32 %v1159_v35, %v1158_v23  ;;  %v1165_v20 = vadd.f32 %v1164_v13, %v1163_v36  ;;  %2293 = vmatmul.mubr.msk.f32.vlgmr.msra.gmra.mrb[14].mxu1 %vm1006_vm0, %v1208_v37 }
 0x271   : > { %v1194_v43 = vadd.f32 %v1193_v12, %v1192_v29  ;;  %v1069_v44 = vmax.f32 %v1067_v31, %v1068_v38  ;;  %2415 = vmatpush3.bf16.msra.mxu1 %v2884_v50  ;;  %v1209_v45 = vmul.f32 %v2526_v39, %v2950_v48  ;;  %v1210_v26 = vmul.f32 %v2526_v39, %v2954_v54 }
 0x272   : > { %v1166_v46 = vrot.slane %v1165_v20, 4  ;;  %2421 = vmatprep.subr.bf16.mxu1 %v2888_v60  ;;  %v1161_v42 = vrot.slane %v1160_v41, 1 }
 0x273   : > { %v1195_v40 = vrot.slane %v1194_v43, 2  ;;  %v1091_v49 = vsub.f32 %v2984_v47, %v1069_v44  ;;  %v1092_v28 = vsub.f32 %v2972_v30, %v1069_v44  ;;  %2299 = vmatprep.mubr.msk.f32.mxu1 %vm1006_vm0, %v1209_v45 }
 0x274   : > { %v1167_v51 = vadd.f32 %v1166_v46, %v1165_v20  ;;  %2300 = vmatmul.mubr.msk.f32.vlgmr.msra.gmra.mrb[16].mxu1 %vm1006_vm0, %v1210_v26  ;;  %v1162_v24 = vadd.f32 %v1161_v42, %v1160_v41 }
 0x275   : > { %v1196_v50 = vadd.f32 %v1195_v40, %v1194_v43  ;;  %v1119_v53 = vmul.f32 1.442695, %v1091_v49  ;;  %v1121_v48 = vmul.f32 1.442695, %v1092_v28  ;;  %2423 = vmatpush3.bf16.msra.mxu1 %v2888_v60 }
 0x276   : > { %v1168_v54 = vrot.slane %v1167_v51, 2  ;;  %2429 = vmatprep.subr.bf16.mxu1 %v2892_v6  ;;  %2533 = vrcp.f32 %v1162_v24 }
 0x277   : > { %v2528_v56 = vpop.eup %2527  ;;  %2535 = vpow2.f32 %v1119_v53  ;;  %v1197_v47 = vrot.slane %v1196_v50, 1 }
 0x278   : > { %v2530_v57 = vpop.eup %2529  ;;  %v1169_v30 = vadd.f32 %v1168_v54, %v1167_v51  ;;  %v1172_v63 = vsel %vm1006_vm0, %v2528_v56, 0.0  ;;  %2537 = vpow2.f32 %v1121_v48 }
 0x279   : > { %v2532_v0 = vpop.eup %2531  ;;  %v1173_v2 = vsel %vm1006_vm0, %v2530_v57, 0.0  ;;  %v1198_v3 = vadd.f32 %v1197_v47, %v1196_v50 }
 0x27a   : > { %v1174_v4 = vadd.f32 %v1173_v2, %v1172_v63  ;;  %v1211_v5 = vmul.f32 %v2532_v0, %v2970_v25  ;;  %v1212_v60 = vmul.f32 %v2532_v0, %v2974_v33  ;;  %v1170_v7 = vrot.slane %v1169_v30, 1 }
 0x27b   : > { %2539 = vrcp.f32 %v1198_v3 }
 0x27c   : > { %v1175_v8 = vrot.slane %v1174_v4, 4  ;;  %2306 = vmatprep.mubr.msk.f32.mxu0 %vm1006_vm0, %v1211_v5  ;;  %v1171_v9 = vadd.f32 %v1170_v7, %v1169_v30 }
 0x27d   : > { %2307 = vmatmul.mubr.msk.f32.vlgmr.msra.gmra.mrb[18].mxu0 %vm1006_vm0, %v1212_v60 }
 0x27e   : > { %v1176_v10 = vadd.f32 %v1175_v8, %v1174_v4  ;;  %2427 = vmatpush3.bf16.msra.mxu0 %v2890_v1  ;;  %2541 = vrcp.f32 %v1171_v9 }
 0x27f   : > { %2433 = vmatprep.subr.bf16.mxu0 %v2895_v11 }
 0x280   : > { %v2534_v15 = vpop.eup %2533  ;;  %v1177_v17 = vrot.slane %v1176_v10, 2 }
 0x281   : > { %v2536_v19 = vpop.eup %2535  ;;  %v1213_v25 = vmul.f32 %v2534_v15, %v2988_v55  ;;  %v1214_v33 = vmul.f32 %v2534_v15, %v2990_v62 }
 0x282   : > { %v2538_v61 = vpop.eup %2537  ;;  %v1178_v58 = vadd.f32 %v1177_v17, %v1176_v10  ;;  %v1181_v21 = vsel %vm1006_vm0, %v2536_v19, 0.0 }
 0x283   : > { %v1182_v22 = vsel %vm1006_vm0, %v2538_v61, 0.0  ;;  %2313 = vmatprep.mubr.msk.f32.mxu1 %vm1006_vm0, %v1213_v25 }
 0x284   : > { %v1183_v23 = vadd.f32 %v1182_v22, %v1181_v21  ;;  %2314 = vmatmul.mubr.msk.f32.vlgmr.msra.gmra.mrb[18].mxu1 %vm1006_vm0, %v1214_v33  ;;  %v1179_v1 = vrot.slane %v1178_v58, 1 }
 0x285   : > { %v2540_v59 = vpop.eup %2539  ;;  %2431 = vmatpush3.bf16.msra.mxu1 %v2892_v6 }
 0x286   : > { %v1184_v27 = vrot.slane %v1183_v23, 4  ;;  %2437 = vmatprep.subr.bf16.mxu1 %v2898_v16  ;;  %v1180_v55 = vadd.f32 %v1179_v1, %v1178_v58  ;;  %v1221_v62 = vmul.f32 %v2540_v59, %v2998_v14  ;;  %v1222_v29 = vmul.f32 %v2540_v59, %v3000_v18 }
 0x288   : > { %v2542_v31 = vpop.eup %2541  ;;  %v1185_v32 = vadd.f32 %v1184_v27, %v1183_v23  ;;  %2543 = vrcp.f32 %v1180_v55 }
 0x289   : > { %v1215_v35 = vmul.f32 %v2542_v31, %v3006_v52  ;;  %v1216_v36 = vmul.f32 %v2542_v31, %v3009_v34 }
 0x28a   : > { %v1186_v37 = vrot.slane %v1185_v32, 2 }
 0x28b   : > { %2320 = vmatprep.mubr.msk.f32.mxu0 %vm1006_vm0, %v1215_v35 }
 0x28c   : > { %v1187_v12 = vadd.f32 %v1186_v37, %v1185_v32  ;;  %2321 = vmatmul.mubr.msk.f32.vlgmr.msra.gmra.mrb[20].mxu0 %vm1006_vm0, %v1216_v36 }
 0x28d   : > { %2435 = vmatpush3.bf16.msra.mxu0 %v2895_v11 }
 0x28e   : > { %v1188_v6 = vrot.slane %v1187_v12, 1 }
 0x290   : > { %v1189_v13 = vadd.f32 %v1188_v6, %v1187_v12 }
 0x292   : > { %v2544_v14 = vpop.eup %2543  ;;  %2545 = vrcp.f32 %v1189_v13 }
 0x293   : > { %v1217_v18 = vmul.f32 %v2544_v14, %v2528_v56  ;;  %v1218_v38 = vmul.f32 %v2544_v14, %v2530_v57 }
 0x295   : > { %2327 = vmatprep.mubr.msk.f32.mxu1 %vm1006_vm0, %v1217_v18 }
 0x296   : > { %2328 = vmatmul.mubr.msk.f32.vlgmr.msra.gmra.mrb[20].mxu1 %vm1006_vm0, %v1218_v38 }
 0x297   : > { %2439 = vmatpush3.bf16.msra.mxu1 %v2898_v16  ;;  %2341 = vmatprep.mubr.msk.f32.mxu1 %vm1006_vm0, %v1221_v62 }
 0x29a   : > { %2342 = vmatmul.mubr.msk.f32.vlgmr.msra.gmra.mrb[22].mxu1 %vm1006_vm0, %v1222_v29 }
 0x29c   : > { %v2546_v52 = vpop.eup %2545 }
 0x29d   : > { %v1219_v34 = vmul.f32 %v2546_v52, %v2536_v19  ;;  %v1220_v39 = vmul.f32 %v2546_v52, %v2538_v61 }
 0x29f   : > { %2334 = vmatprep.mubr.msk.f32.mxu0 %vm1006_vm0, %v1219_v34 }
 0x2a0   : > { %2335 = vmatmul.mubr.msk.f32.vlgmr.msra.gmra.mrb[22].mxu0 %vm1006_vm0, %v1220_v39 }
 0x343   : > { %v2294_v11 = vpop.f32.mrb[14].mxu1 }
 0x344   : > { %v1295_v41 = vpop.f32.mrb[15].mxu1 }
 0x345   : > { %v1871_v20 = vmax.f32 %v1295_v41, %v2294_v11 }
 0x347   : > { %v1872_v43 = vrot.slane %v1871_v20, 4  ;;  %v2301_v44 = vpop.f32.mrb[16].mxu1 }
 0x348   : > { %v1376_v45 = vpop.f32.mrb[17].mxu1 }
 0x349   : > { %v1873_v26 = vmax.f32 %v1871_v20, %v1872_v43  ;;  %v1878_v46 = vmax.f32 %v1376_v45, %v2301_v44 }
 0x34b   : > { %v1874_v16 = vrot.slane %v1873_v26, 2  ;;  %v1879_v42 = vrot.slane %v1878_v46, 4 }
 0x34d   : > { %v1875_v40 = vmax.f32 %v1873_v26, %v1874_v16  ;;  %v1880_v49 = vmax.f32 %v1878_v46, %v1879_v42 }
 0x34f   : > { %v1881_v28 = vrot.slane %v1880_v49, 2  ;;  %v1876_v24 = vrot.slane %v1875_v40, 1 }
 0x350   : > { %v2308_v51 = vpop.f32.mrb[18].mxu0 }
 0x351   : > { %v1882_v50 = vmax.f32 %v1880_v49, %v1881_v28  ;;  %v1457_v53 = vpop.f32.mrb[19].mxu0  ;;  %v1877_v47 = vmax.f32 %v1875_v40, %v1876_v24 }
 0x352   : > { %v1885_v48 = vmax.f32 %v1457_v53, %v2308_v51 }
 0x353   : > { %v1883_v54 = vrot.slane %v1882_v50, 1 }
 0x354   : > { %v1886_v56 = vrot.slane %v1885_v48, 4 }
 0x355   : > { %v1884_v57 = vmax.f32 %v1882_v50, %v1883_v54 }
 0x356   : > { %v1887_v30 = vmax.f32 %v1885_v48, %v1886_v56 }
 0x357   : > { %v1936_v63 = vsel %vm1935_vm1, %v1884_v57, %v1877_v47  ;;  %v2315_v0 = vpop.f32.mrb[18].mxu1 }
 0x358   : > { %v1888_v2 = vrot.slane %v1887_v30, 2  ;;  %v1538_v3 = vpop.f32.mrb[19].mxu1 }
 0x359   : > { %v1892_v4 = vmax.f32 %v1538_v3, %v2315_v0 }
 0x35a   : > { %v1889_v5 = vmax.f32 %v1887_v30, %v1888_v2 }
 0x35b   : > { %v1893_v60 = vrot.slane %v1892_v4, 4 }
 0x35c   : > { %v1890_v7 = vrot.slane %v1889_v5, 1 }
 0x35d   : > { %v1894_v8 = vmax.f32 %v1892_v4, %v1893_v60 }
 0x35e   : > { %v1891_v9 = vmax.f32 %v1889_v5, %v1890_v7 }
 0x35f   : > { %v1895_v10 = vrot.slane %v1894_v8, 2  ;;  %v2322_v15 = vpop.f32.mrb[20].mxu0 }
 0x360   : > { %v1938_v17 = vsel %vm1937_vm2, %v1891_v9, %v1936_v63  ;;  %v1619_v19 = vpop.f32.mrb[21].mxu0 }
 0x361   : > { %v1896_v25 = vmax.f32 %v1894_v8, %v1895_v10  ;;  %v1899_v33 = vmax.f32 %v1619_v19, %v2322_v15 }
 0x363   : > { %v1897_v61 = vrot.slane %v1896_v25, 1  ;;  %v1900_v58 = vrot.slane %v1899_v33, 4 }
 0x365   : > { %v1898_v21 = vmax.f32 %v1896_v25, %v1897_v61  ;;  %v1901_v22 = vmax.f32 %v1899_v33, %v1900_v58 }
 0x367   : > { %v1940_v23 = vsel %vm1939_vm3, %v1898_v21, %v1938_v17  ;;  %v1902_v1 = vrot.slane %v1901_v22, 2 }
 0x369   : > { %v1903_v59 = vmax.f32 %v1901_v22, %v1902_v1  ;;  %v2329_v27 = vpop.f32.mrb[20].mxu1 }
 0x36a   : > { %v1700_v55 = vpop.f32.mrb[21].mxu1 }
 0x36b   : > { %v1904_v62 = vrot.slane %v1903_v59, 1  ;;  %v1906_v29 = vmax.f32 %v1700_v55, %v2329_v27 }
 0x36d   : > { %v1905_v31 = vmax.f32 %v1903_v59, %v1904_v62  ;;  %v1907_v32 = vrot.slane %v1906_v29, 4  ;;  %v2343_v35 = vpop.f32.mrb[22].mxu1 }
 0x36e   : > { %v1862_v36 = vpop.f32.mrb[23].mxu1 }
 0x36f   : > { %v1942_v37 = vsel %vm1941_vm4, %v1905_v31, %v1940_v23  ;;  %v1908_v12 = vmax.f32 %v1906_v29, %v1907_v32  ;;  %v1920_v6 = vmax.f32 %v1862_v36, %v2343_v35 }
 0x371   : > { %v1909_v13 = vrot.slane %v1908_v12, 2  ;;  %v1921_v14 = vrot.slane %v1920_v6, 4 }
 0x373   : > { %v1910_v18 = vmax.f32 %v1908_v12, %v1909_v13  ;;  %v1922_v38 = vmax.f32 %v1920_v6, %v1921_v14  ;;  %v2336_v52 = vpop.f32.mrb[22].mxu0 }
 0x374   : > { %v1781_v34 = vpop.f32.mrb[23].mxu0 }
 0x375   : > { %v1911_v39 = vrot.slane %v1910_v18, 1  ;;  %v1913_v11 = vmax.f32 %v1781_v34, %v2336_v52  ;;  %v1923_v41 = vrot.slane %v1922_v38, 2 }
 0x377   : > { %v1912_v20 = vmax.f32 %v1910_v18, %v1911_v39  ;;  %v1914_v43 = vrot.slane %v1913_v11, 4  ;;  %v1924_v26 = vmax.f32 %v1922_v38, %v1923_v41 }
 0x379   : > { %v1944_v44 = vsel %vm1943_vm5, %v1912_v20, %v1942_v37  ;;  %v1915_v45 = vmax.f32 %v1913_v11, %v1914_v43  ;;  %v1925_v42 = vrot.slane %v1924_v26, 1 }
 0x37b   : > { %v1916_v46 = vrot.slane %v1915_v45, 2  ;;  %v1926_v28 = vmax.f32 %v1924_v26, %v1925_v42 }
 0x37d   : > { %v1917_v16 = vmax.f32 %v1915_v45, %v1916_v46 }
 0x37f   : > { %v1918_v40 = vrot.slane %v1917_v16, 1 }
 0x381   : > { %v1919_v49 = vmax.f32 %v1917_v16, %v1918_v40 }
 0x383   : > { %v1946_v51 = vsel %vm1945_vm6, %v1919_v49, %v1944_v44 }
 0x384   : > { %v1948_v24 = vsel %vm1947_vm7, %v1926_v28, %v1946_v51 }
 0x385   : > { %1950 = vst [vmem:[%s204_s4] sm:$0xff] %v1948_v24 }
 0x386   : > { %2618 = shalt.err (!%p2615_p7)
}
 0x387   : > { %s2619_s22 = scalar_lea.hbm %s3063_s27, 128  ;;  %s2623_s10 = scalar_lea.hbm %s3110_s3, 256 }
 0x388   : > { %p2620_p9 = scmp.ne.s32.totalorder %s3063_s27, %s2619_s22  ;;  %p2624_p5 = scmp.lt.u32.totalorder %s3063_s27, %s3110_s3 }
 0x389   : > { %p2625_p11 = scmp.lt.u32.totalorder %s2623_s10, %s2619_s22  ;;  %p2627_p4 = scmp.lt.u32.totalorder %s2619_s22, %s3063_s27 }
 0x38a   : > { %p2621_p1 = pnand %p2620_p9, %p2796_p12 }
 0x38b   : > { %p2626_p2 = por %p2625_p11, %p2624_p5 }
 0x38c   : > { %p2622_p0 = pneg %p2621_p1 }
 0x38d   : > { %p2628_p6 = por %p2627_p4, %p2626_p2 }
 0x38f   : > { %p2629_p8 = pnand %p2628_p6, %p2622_p0 }
 0x391   : > { %2632 = shalt.err (!%p2629_p8)
}
 0x392   : > { %2446 = dma.vmem_to_hbm [thread:$0]  (%p2796_p12), %s3065_s25, 128, %s3063_s27, %s1952_s28  }
 0x393 PF: > { %s1977_s20 = sand.u32 1, %s2663_s12   ;;  %p3125_p10 = scmp.ne.s32.totalorder %s3115_s19, 0 }
 0x394   : > { %p3126_p13 = scmp.ge.s32.totalorder %s2675_s15, 2  ;;  %s1978_s8 = scalar_lea.sflag [#allocation4], %s1977_s20 }
 0x396   : > { %p2457_p3 = pnand %p3126_p13, %p3125_p10 }
 0x398   : > { %2658 = dma.done.wait (!%p2457_p3), %s1978_s8, 128  }
 0x399   : > { %2660 = vsyncadd (!%p2457_p3), %s1978_s8, 4294967168  ;;  %p17_p7 = scmp.ge.s32.totalorder %s2758_s24, 4   ;;  %s3127_s12 = smov %s2667_s13 }
 0x39a   : > { %s3128_s13 = smov %s2671_s14  ;;  %s3129_s14 = smov %s2792_s17 }
 0x39b   : > { %s3130_s15 = smov %s2758_s24  ;;  %19 = sbr.rel (!%p17_p7) target bundleno = 6 (0x6), region = 81 }
 0x3a2   :  { %1983 = vsyncpa [#allocation3], 1 }
 0x3a3   :  { %1985 = vsyncpa [#allocation3 + $0x1], 1 }
 0x3a4   :  { %1986 = vsyncpa [#allocation6], 1 }
 0x3a5   :  { %1987 = vsyncpa [#allocation4], 1 }
 0x3a6   :  { %1989 = vsyncpa [#allocation4 + $0x1], 1 }

</bundles_post_ra>
